<compile_context>
chip_gen: v5e
topology: v5e:2x2
jax: 0.10.0
libtpu: 0.0.40
codegen_flags: <defaults>
</compile_context>

<pallas_src>
import jax
import jax.numpy as jnp
from jax.experimental import pallas as pl
from jax.experimental.pallas import tpu as pltpu

_LANE = 128
_SUBLANE = 8


def _round_up(n, m):
    return ((n + m - 1) // m) * m


def _mlp_kernel(x_ref, w1_ref, b1_ref, w2_ref, b2_ref, w3_ref, b3_ref, o_ref):
    """One batch tile per grid step; weights/biases are VMEM-resident (constant
    index_map).  Everything is transposed: x (in_dim, TB), hidden (HP, TB),
    out (OP, TB) — batch sits on the lane axis, so all loads/stores are
    lane-dense and unmasked."""
    x = x_ref[...]                                    # (in_dim, TB) f32
    w1 = w1_ref[...].astype(jnp.float32)              # (HP, in_dim) f32

    # Layer 1: K = in_dim (4) is far too small to feed the MXU usefully, so do
    # it as in_dim broadcast multiply-adds on the VPU (perf-feedback item).
    h1 = b1_ref[...] + w1[:, 0:1] * x[0:1, :]         # (HP, TB)
    for k in range(1, x_ref.shape[0]):                # static, unrolled
        h1 = h1 + w1[:, k:k + 1] * x[k:k + 1, :]
    h1 = jnp.maximum(h1, 0.0).astype(w2_ref.dtype)

    # Layers 2/3 on the MXU with f32 accumulation (weights may be bf16).
    h2 = jnp.dot(w2_ref[...], h1, preferred_element_type=jnp.float32) + b2_ref[...]
    h2 = jnp.maximum(h2, 0.0).astype(w3_ref.dtype)
    o_ref[...] = (
        jnp.dot(w3_ref[...], h2, preferred_element_type=jnp.float32) + b3_ref[...]
    ).astype(o_ref.dtype)


def _choose_tiling(B, tb_max):
    """Pick (TB, n_tiles): TB a multiple of 128 (lane axis), grid >= 2 when B
    allows (v7x megacore), TB derived from B so padded-row waste stays small."""
    tb_max = max(_LANE, (tb_max // _LANE) * _LANE)
    if B <= _LANE:
        return _LANE, 1
    n_tiles = max(2, pl.cdiv(B, tb_max))
    tb = min(_round_up(pl.cdiv(B, n_tiles), _LANE), tb_max)
    return tb, pl.cdiv(B, tb)


def dqn_v0_forward(x, padded_params, *, out_dim, tb_max=2048):
    """x: (B, in_dim) float32.  padded_params: output of pad_params().
    Returns (B, out_dim) float32."""
    w1, b1 = padded_params["w1"], padded_params["b1"]
    w2, b2 = padded_params["w2"], padded_params["b2"]
    w3, b3 = padded_params["w3"], padded_params["b3"]

    B, in_dim = x.shape
    HP = w2.shape[0]                 # padded hidden (128)
    OP = w3.shape[0]                 # sublane-padded out_dim (8)

    TB, n_tiles = _choose_tiling(B, tb_max)
    Bp = TB * n_tiles

    # Transpose + pad the input once (tiny: in_dim * B * 4 bytes), so the kernel
    # sees a lane-dense (in_dim, Bp) slab with batch on the lane axis.
    x_t = jnp.pad(x.T, ((0, 0), (0, Bp - B)))

    const = lambda i: (0, 0)         # same block every step -> VMEM-resident

    weight_bytes = sum(int(a.size) * a.dtype.itemsize for a in (w1, b1, w2, b2, w3, b3))
    cost = pl.CostEstimate(
        flops=2 * Bp * (in_dim * HP + HP * HP + HP * OP),
        transcendentals=0,
        bytes_accessed=Bp * in_dim * x.dtype.itemsize + Bp * OP * 4 + weight_bytes,
    )

    out_t = pl.pallas_call(
        _mlp_kernel,
        out_shape=jax.ShapeDtypeStruct((OP, Bp), jnp.float32),
        grid=(n_tiles,),
        in_specs=[
            pl.BlockSpec((in_dim, TB), lambda i: (0, i)),   # x streams over batch
            pl.BlockSpec(w1.shape, const),
            pl.BlockSpec(b1.shape, const),
            pl.BlockSpec(w2.shape, const),
            pl.BlockSpec(b2.shape, const),
            pl.BlockSpec(w3.shape, const),
            pl.BlockSpec(b3.shape, const),
        ],
        out_specs=pl.BlockSpec((OP, TB), lambda i: (0, i)),
        compiler_params=pltpu.CompilerParams(
            # Batch grid is embarrassingly parallel -> megacore-shards on v7x.
            # Double-buffered x/out tiles + resident weights stay well under the
            # scoped-VMEM default on v5e/v6e/v7x even at tb_max=8192, so no
            # vmem_limit_bytes override is required.
            dimension_semantics=("parallel",),
        ),
        cost_estimate=cost,
    )(x_t, w1, b1, w2, b2, w3, b3)

    # Tiny (out_dim, B) slice + transpose: 32 B/row of writeback re-read vs.
    # 512 B/row in v1.
    return out_t[:out_dim, :B].T


def init_params(key, in_dim, out_dim, hidden=25):
    """PyTorch nn.Linear layout/init: weight (out, in), bias (out,), both
    U(-1/sqrt(fan_in), 1/sqrt(fan_in))."""
    ks = jax.random.split(key, 6)

    def lin(kw, kb, fan_in, fan_out):
        bound = 1.0 / float(fan_in) ** 0.5
        w = jax.random.uniform(kw, (fan_out, fan_in), jnp.float32, -bound, bound)
        b = jax.random.uniform(kb, (fan_out,), jnp.float32, -bound, bound)
        return w, b

    w1, b1 = lin(ks[0], ks[1], in_dim, hidden)
    w2, b2 = lin(ks[2], ks[3], hidden, hidden)
    w3, b3 = lin(ks[4], ks[5], hidden, out_dim)
    return {"w1": w1, "b1": b1, "w2": w2, "b2": b2, "w3": w3, "b3": b3}


def pad_params(params, *, weight_dtype=jnp.float32):
    """Zero-pad to transposed, MXU/lane-friendly shapes:
         w1 (HP, in_dim), w2 (HP, HP), w3 (OP, HP), biases as (rows, 1) columns,
       with HP = round_up(hidden, 128), OP = round_up(out_dim, 8).
    Padding is mathematically inert (ReLU(0)=0; zero rows/cols contribute 0).
    The MXU-layer weights may be cast to bf16 ONCE here (perf feedback);
    w1 (VPU layer) and all biases stay f32 for exact bias adds."""
    w1, b1 = params["w1"], params["b1"]
    w2, b2 = params["w2"], params["b2"]
    w3, b3 = params["w3"], params["b3"]
    hidden = w1.shape[0]
    out_dim = w3.shape[0]
    hp = _round_up(hidden, _LANE)
    op = _round_up(out_dim, _SUBLANE)

    def padw(w, rows, cols, dtype):
        return jnp.pad(w, ((0, rows - w.shape[0]), (0, cols - w.shape[1]))).astype(dtype)

    def padb(b, rows):
        return jnp.pad(b, (0, rows - b.shape[0])).reshape(rows, 1).astype(jnp.float32)

    return {
        "w1": padw(w1, hp, w1.shape[1], jnp.float32),
        "b1": padb(b1, hp),
        "w2": padw(w2, hp, hp, weight_dtype),
        "b2": padb(b2, hp),
        "w3": padw(w3, op, hp, weight_dtype),
        "b3": padb(b3, op),
    }


def _reference(x, p):
    h1 = jnp.maximum(x @ p["w1"].T + p["b1"], 0.0)
    h2 = jnp.maximum(h1 @ p["w2"].T + p["b2"], 0.0)
    return h2 @ p["w3"].T + p["b3"]


if __name__ == "__main__":
    key = jax.random.PRNGKey(0)
    kp, kx, kx2 = jax.random.split(key, 3)

    batch, in_dim, out_dim = 8, 4, 3
    params = init_params(kp, in_dim, out_dim)
    padded_f32 = pad_params(params)                       # exact f32 path (default)

    # Small batch: single tile.
    x = jax.random.normal(kx, (batch, in_dim), jnp.float32)
    out = dqn_v0_forward(x, padded_f32, out_dim=out_dim)
    jax.block_until_ready(out)
    ref = _reference(x, params)
    assert out.shape == (batch, out_dim)
    assert jnp.allclose(out, ref, atol=1e-4, rtol=1e-4)

    # Larger, non-multiple batch: exercises the >=2-step parallel grid and the
    # adaptive-TB remainder handling.
    big_b = 1030
    xb = jax.random.normal(kx2, (big_b, in_dim), jnp.float32)
    outb = dqn_v0_forward(xb, padded_f32, out_dim=out_dim)
    jax.block_until_ready(outb)
    refb = _reference(xb, params)
    assert outb.shape == (big_b, out_dim)
    assert jnp.allclose(outb, refb, atol=1e-4, rtol=1e-4)

    # Optional bf16-weight path (secondary perf win per review): weights cast
    # once offline, f32 MXU accumulation, looser tolerance.
    padded_bf16 = pad_params(params, weight_dtype=jnp.bfloat16)
    outh = dqn_v0_forward(xb, padded_bf16, out_dim=out_dim)
    jax.block_until_ready(outh)
    assert outh.shape == (big_b, out_dim)
    assert jnp.allclose(outh, refb, atol=5e-2, rtol=5e-2)

    print("KERNEL_OK")
</pallas_src>

<mosaic_0001>
module attributes {stable_mosaic.version = 11 : i64} {
  func.func @_mlp_kernel(%arg0: i32, %arg1: memref<4x128xf32, #tpu.memory_space<vmem>>, %arg2: memref<128x4xf32, #tpu.memory_space<vmem>>, %arg3: memref<128x1xf32, #tpu.memory_space<vmem>>, %arg4: memref<128x128xf32, #tpu.memory_space<vmem>>, %arg5: memref<128x1xf32, #tpu.memory_space<vmem>>, %arg6: memref<8x128xf32, #tpu.memory_space<vmem>>, %arg7: memref<8x1xf32, #tpu.memory_space<vmem>>, %arg8: memref<8x128xf32, #tpu.memory_space<vmem>>) attributes {dimension_semantics = [#tpu.dimension_semantics<parallel>], iteration_bounds = array<i64: 1>, scalar_prefetch = 0 : i64, scratch_operands = 0 : i64, tpu.core_type = #tpu.core_type<tc>, window_params = [{transform_indices = @transform_0, window_bounds = array<i64: 4, 128>}, {pipeline_mode = #tpu.pipeline_mode<synchronous>, transform_indices = @transform_1, window_bounds = array<i64: 128, 4>}, {pipeline_mode = #tpu.pipeline_mode<synchronous>, transform_indices = @transform_2, window_bounds = array<i64: 128, 1>}, {pipeline_mode = #tpu.pipeline_mode<synchronous>, transform_indices = @transform_3, window_bounds = array<i64: 128, 128>}, {pipeline_mode = #tpu.pipeline_mode<synchronous>, transform_indices = @transform_4, window_bounds = array<i64: 128, 1>}, {pipeline_mode = #tpu.pipeline_mode<synchronous>, transform_indices = @transform_5, window_bounds = array<i64: 8, 128>}, {pipeline_mode = #tpu.pipeline_mode<synchronous>, transform_indices = @transform_6, window_bounds = array<i64: 8, 1>}, {transform_indices = @transform_7, window_bounds = array<i64: 8, 128>}]} {
    %c0 = arith.constant 0 : index
    %c0_0 = arith.constant 0 : index
    %0 = vector.load %arg1[%c0, %c0_0] : memref<4x128xf32, #tpu.memory_space<vmem>>, vector<4x128xf32>
    %c0_1 = arith.constant 0 : index
    %c0_2 = arith.constant 0 : index
    %1 = vector.load %arg2[%c0_1, %c0_2] : memref<128x4xf32, #tpu.memory_space<vmem>>, vector<128x4xf32>
    %c0_3 = arith.constant 0 : index
    %c0_4 = arith.constant 0 : index
    %2 = vector.load %arg3[%c0_3, %c0_4] : memref<128x1xf32, #tpu.memory_space<vmem>>, vector<128x1xf32>
    %3 = vector.extract_strided_slice %1 {offsets = [0, 0], sizes = [128, 1], strides = [1, 1]} : vector<128x4xf32> to vector<128x1xf32>
    %4 = vector.extract_strided_slice %0 {offsets = [0, 0], sizes = [1, 128], strides = [1, 1]} : vector<4x128xf32> to vector<1x128xf32>
    %5 = vector.broadcast %3 : vector<128x1xf32> to vector<128x128xf32>
    %6 = vector.broadcast %4 : vector<1x128xf32> to vector<128x128xf32>
    %7 = arith.mulf %5, %6 : vector<128x128xf32>
    %8 = vector.broadcast %2 : vector<128x1xf32> to vector<128x128xf32>
    %9 = arith.addf %8, %7 : vector<128x128xf32>
    %10 = vector.extract_strided_slice %1 {offsets = [0, 1], sizes = [128, 1], strides = [1, 1]} : vector<128x4xf32> to vector<128x1xf32>
    %11 = vector.extract_strided_slice %0 {offsets = [1, 0], sizes = [1, 128], strides = [1, 1]} : vector<4x128xf32> to vector<1x128xf32>
    %12 = vector.broadcast %10 : vector<128x1xf32> to vector<128x128xf32>
    %13 = vector.broadcast %11 : vector<1x128xf32> to vector<128x128xf32>
    %14 = arith.mulf %12, %13 : vector<128x128xf32>
    %15 = arith.addf %9, %14 : vector<128x128xf32>
    %16 = vector.extract_strided_slice %1 {offsets = [0, 2], sizes = [128, 1], strides = [1, 1]} : vector<128x4xf32> to vector<128x1xf32>
    %17 = vector.extract_strided_slice %0 {offsets = [2, 0], sizes = [1, 128], strides = [1, 1]} : vector<4x128xf32> to vector<1x128xf32>
    %18 = vector.broadcast %16 : vector<128x1xf32> to vector<128x128xf32>
    %19 = vector.broadcast %17 : vector<1x128xf32> to vector<128x128xf32>
    %20 = arith.mulf %18, %19 : vector<128x128xf32>
    %21 = arith.addf %15, %20 : vector<128x128xf32>
    %22 = vector.extract_strided_slice %1 {offsets = [0, 3], sizes = [128, 1], strides = [1, 1]} : vector<128x4xf32> to vector<128x1xf32>
    %23 = vector.extract_strided_slice %0 {offsets = [3, 0], sizes = [1, 128], strides = [1, 1]} : vector<4x128xf32> to vector<1x128xf32>
    %24 = vector.broadcast %22 : vector<128x1xf32> to vector<128x128xf32>
    %25 = vector.broadcast %23 : vector<1x128xf32> to vector<128x128xf32>
    %26 = arith.mulf %24, %25 : vector<128x128xf32>
    %27 = arith.addf %21, %26 : vector<128x128xf32>
    %cst = arith.constant 0.000000e+00 : f32
    %28 = vector.broadcast %cst : f32 to vector<128x128xf32>
    %29 = arith.maximumf %27, %28 : vector<128x128xf32>
    %c0_5 = arith.constant 0 : index
    %c0_6 = arith.constant 0 : index
    %30 = vector.load %arg4[%c0_5, %c0_6] : memref<128x128xf32, #tpu.memory_space<vmem>>, vector<128x128xf32>
    %cst_7 = arith.constant dense<0.000000e+00> : vector<128x128xf32>
    %31 = tpu.matmul %30, %29, %cst_7 {dimension_numbers = #tpu.dot_dimension_numbers<[1], [0], [0], [1], [0, 0, 1, 1], [], []>} : vector<128x128xf32>, vector<128x128xf32>, vector<128x128xf32> -> vector<128x128xf32>
    %c0_8 = arith.constant 0 : index
    %c0_9 = arith.constant 0 : index
    %32 = vector.load %arg5[%c0_8, %c0_9] : memref<128x1xf32, #tpu.memory_space<vmem>>, vector<128x1xf32>
    %33 = vector.broadcast %32 : vector<128x1xf32> to vector<128x128xf32>
    %34 = arith.addf %31, %33 : vector<128x128xf32>
    %cst_10 = arith.constant 0.000000e+00 : f32
    %35 = vector.broadcast %cst_10 : f32 to vector<128x128xf32>
    %36 = arith.maximumf %34, %35 : vector<128x128xf32>
    %c0_11 = arith.constant 0 : index
    %c0_12 = arith.constant 0 : index
    %37 = vector.load %arg6[%c0_11, %c0_12] : memref<8x128xf32, #tpu.memory_space<vmem>>, vector<8x128xf32>
    %cst_13 = arith.constant dense<0.000000e+00> : vector<8x128xf32>
    %38 = tpu.matmul %37, %36, %cst_13 {dimension_numbers = #tpu.dot_dimension_numbers<[1], [0], [0], [1], [0, 0, 1, 1], [], []>} : vector<8x128xf32>, vector<128x128xf32>, vector<8x128xf32> -> vector<8x128xf32>
    %c0_14 = arith.constant 0 : index
    %c0_15 = arith.constant 0 : index
    %39 = vector.load %arg7[%c0_14, %c0_15] : memref<8x1xf32, #tpu.memory_space<vmem>>, vector<8x1xf32>
    %40 = vector.broadcast %39 : vector<8x1xf32> to vector<8x128xf32>
    %41 = arith.addf %38, %40 : vector<8x128xf32>
    %c0_16 = arith.constant 0 : index
    %c0_17 = arith.constant 0 : index
    %42 = vector.load %arg8[%c0_16, %c0_17] : memref<8x128xf32, #tpu.memory_space<vmem>>, vector<8x128xf32>
    tpu.vector_store %arg8[%c0_16, %c0_17], %41 {strides = array<i32>} : memref<8x128xf32, #tpu.memory_space<vmem>>, vector<8x128xf32>,
    return
  }
  func.func @transform_0(%arg0: i32) -> (i32, i32) {
    %c0_i32 = arith.constant 0 : i32
    %c0_i32_0 = arith.constant 0 : i32
    return %c0_i32, %arg0 : i32, i32
  }
  func.func @transform_1(%arg0: i32) -> (i32, i32) {
    %c0_i32 = arith.constant 0 : i32
    %c0_i32_0 = arith.constant 0 : i32
    %c0_i32_1 = arith.constant 0 : i32
    return %c0_i32, %c0_i32_0 : i32, i32
  }
  func.func @transform_2(%arg0: i32) -> (i32, i32) {
    %c0_i32 = arith.constant 0 : i32
    %c0_i32_0 = arith.constant 0 : i32
    %c0_i32_1 = arith.constant 0 : i32
    return %c0_i32, %c0_i32_0 : i32, i32
  }
  func.func @transform_3(%arg0: i32) -> (i32, i32) {
    %c0_i32 = arith.constant 0 : i32
    %c0_i32_0 = arith.constant 0 : i32
    %c0_i32_1 = arith.constant 0 : i32
    return %c0_i32, %c0_i32_0 : i32, i32
  }
  func.func @transform_4(%arg0: i32) -> (i32, i32) {
    %c0_i32 = arith.constant 0 : i32
    %c0_i32_0 = arith.constant 0 : i32
    %c0_i32_1 = arith.constant 0 : i32
    return %c0_i32, %c0_i32_0 : i32, i32
  }
  func.func @transform_5(%arg0: i32) -> (i32, i32) {
    %c0_i32 = arith.constant 0 : i32
    %c0_i32_0 = arith.constant 0 : i32
    %c0_i32_1 = arith.constant 0 : i32
    return %c0_i32, %c0_i32_0 : i32, i32
  }
  func.func @transform_6(%arg0: i32) -> (i32, i32) {
    %c0_i32 = arith.constant 0 : i32
    %c0_i32_0 = arith.constant 0 : i32
    %c0_i32_1 = arith.constant 0 : i32
    return %c0_i32, %c0_i32_0 : i32, i32
  }
  func.func @transform_7(%arg0: i32) -> (i32, i32) {
    %c0_i32 = arith.constant 0 : i32
    %c0_i32_0 = arith.constant 0 : i32
    return %c0_i32, %arg0 : i32, i32
  }
}

</mosaic_0001>

<bundles_post_ra>
// kernel: tpu_custom_call.1
= control target key start
LH: loop header
LB: loop body
LE: loop exit
PB: predicated region body
PF: predicated region fallthrough
CT: control target
= control target key end

     0   :  { %v896_v3 = vmov 0   ;;  %s1424_s0 = inlined_call_operand.vmem [shape: f32[4,128], index: 0, kind: input, shape index: {}]   ;;  %s1425_s1 = inlined_call_operand.vmem [shape: f32[128,4], index: 1, kind: input, shape index: {}]   ;;  %s1426_s2 = inlined_call_operand.vmem [shape: f32[128,1], index: 2, kind: input, shape index: {}]   ;;  %s1427_s3 = inlined_call_operand.vmem [shape: f32[128,128], index: 3, kind: input, shape index: {}]   ;;  %s1428_s4 = inlined_call_operand.vmem [shape: f32[128,1], index: 4, kind: input, shape index: {}]   ;;  %s1429_s5 = inlined_call_operand.vmem [shape: f32[8,128], index: 5, kind: input, shape index: {}]   ;;  %s1430_s6 = inlined_call_operand.vmem [shape: f32[8,1], index: 6, kind: input, shape index: {}]   ;;  %s1431_s7 = inlined_call_operand.hbm [shape: f32[8,128], index: 7, kind: output, shape index: {}]  }
   0x1   :  { %v944_v0 = vld [vmem:[%s1425_s1 + $0x20] sm:$0xff]  ;;  %v949_v1 = vld [vmem:[%s1425_s1 + $0x10] sm:$0xff]  ;;  %836 = vset.pattern.permute.xlu2 %v896_v3  ;;  %835 = vset.pattern.permute.xlu1 %v896_v3 }
   0x2   :  { %v954_v2 = vld [vmem:[%s1425_s1] sm:$0xff]  ;;  %834 = vset.pattern.permute.xlu0 %v896_v3  ;;  %82 = vperm.xlu2 %836, %v944_v0  }
   0x3   :  { %72 = vperm.xlu1 %835, %v949_v1   ;;  %62 = vperm.xlu0 %834, %v954_v2  }
   0x4   :  { %12 = vsyncpa [#allocation3], 0  ;;  %v965_v4 = vld [vmem:[%s1425_s1 + $0x28] sm:$0xff]  ;;  %v970_v5 = vld [vmem:[%s1425_s1 + $0x18] sm:$0xff]  ;;  %v897_v30 = vmov 1   ;;  %v898_v33 = vmov 2  }
   0x5   :  { %v975_v6 = vld [vmem:[%s1425_s1 + $0x8] sm:$0xff]  ;;  %v983_v7 = vld [vmem:[%s1425_s1 + $0x40] sm:$0xff]  ;;  %v988_v8 = vld [vmem:[%s1425_s1 + $0x38] sm:$0xff]  ;;  %v899_v37 = vmov 3   ;;  %s788_s11 = sshll.u32 %s1431_s7, 4  ;;  %s789_s11 = int_to_ptr.hbm [resolvable:$true] %s788_s11 }
   0x6   :  { %v993_v9 = vld [vmem:[%s1425_s1 + $0x30] sm:$0xff]  ;;  %v1001_v10 = vld [vmem:[%s1425_s1 + $0x58] sm:$0xff]  ;;  %v1011_v12 = vld [vmem:[%s1425_s1 + $0x48] sm:$0xff] }
   0x7   :  { %v1006_v11 = vld [vmem:[%s1425_s1 + $0x50] sm:$0xff]  ;;  %v1022_v14 = vld [vmem:[%s1425_s1 + $0x68] sm:$0xff]  ;;  %v1027_v15 = vld [vmem:[%s1425_s1 + $0x60] sm:$0xff] }
   0x8   :  { %v42_v13 = vld [vmem:[%s1425_s1 + $0x70] sm:$0xff]  ;;  %v45_v16 = vld [vmem:[%s1426_s2 + $0x8] sm:$0xff]  ;;  %v44_v17 = vld [vmem:[%s1426_s2] sm:$0xff] }
   0x9   :  { %v1040_v18 = vld [vmem:[%s1425_s1 + $0x78] sm:$0xff]  ;;  %v48_v19 = vld [vmem:[%s1426_s2 + $0x20] sm:$0xff]  ;;  %v46_v21 = vld [vmem:[%s1426_s2 + $0x10] sm:$0xff] }
   0xa   :  { %87 = vperm.xlu2 %836, %v965_v4   ;;  %v47_v20 = vld [vmem:[%s1426_s2 + $0x18] sm:$0xff]  ;;  %v50_v23 = vld [vmem:[%s1426_s2 + $0x30] sm:$0xff]  ;;  %v49_v24 = vld [vmem:[%s1426_s2 + $0x28] sm:$0xff] }
   0xb   :  { %77 = vperm.xlu1 %835, %v970_v5   ;;  %67 = vperm.xlu0 %834, %v975_v6   ;;  %v51_v22 = vld [vmem:[%s1426_s2 + $0x38] sm:$0xff]  ;;  %v54_v25 = vld [vmem:[%s1426_s2 + $0x50] sm:$0xff]  ;;  %v53_v26 = vld [vmem:[%s1426_s2 + $0x48] sm:$0xff] }
   0xc   :  { %v52_v27 = vld [vmem:[%s1426_s2 + $0x40] sm:$0xff]  ;;  %v58_v28 = vld [vmem:[%s1426_s2 + $0x70] sm:$0xff]  ;;  %v59_v29 = vld [vmem:[%s1426_s2 + $0x78] sm:$0xff] }
   0xd   :  { %v57_v31 = vld [vmem:[%s1426_s2 + $0x68] sm:$0xff]  ;;  %v55_v32 = vld [vmem:[%s1426_s2 + $0x58] sm:$0xff]  ;;  %v56_v36 = vld [vmem:[%s1426_s2 + $0x60] sm:$0xff] }
   0xe   :  { %v1116_v42 = vld [vmem:[%s1424_s0] sm:$0xf] }
   0xf   :  { %v1123_v46 = vperm.slane %v1116_v42, 0 }
  0x12   :  { %102 = vperm.xlu2 %836, %v983_v7  }
  0x13   :  { %97 = vperm.xlu1 %835, %v988_v8   ;;  %92 = vperm.xlu0 %834, %v993_v9  }
  0x1a   :  { %117 = vperm.xlu2 %836, %v1001_v10  }
  0x1b   :  { %112 = vperm.xlu1 %835, %v1006_v11   ;;  %107 = vperm.xlu0 %834, %v1011_v12  }
  0x22   :  { %132 = vperm.xlu2 %836, %v42_v13  }
  0x23   :  { %127 = vperm.xlu1 %835, %v1022_v14   ;;  %122 = vperm.xlu0 %834, %v1027_v15  }
  0x2a   :  { %164 = vperm.xlu2 %836, %v45_v16  }
  0x2b   :  { %159 = vperm.xlu1 %835, %v44_v17   ;;  %137 = vperm.xlu0 %834, %v1040_v18  }
  0x32   :  { %179 = vperm.xlu2 %836, %v48_v19  }
  0x33   :  { %174 = vperm.xlu1 %835, %v47_v20   ;;  %169 = vperm.xlu0 %834, %v46_v21  }
  0x3a   :  { %194 = vperm.xlu2 %836, %v51_v22  }
  0x3b   :  { %189 = vperm.xlu1 %835, %v50_v23   ;;  %184 = vperm.xlu0 %834, %v49_v24  }
  0x42   :  { %209 = vperm.xlu2 %836, %v54_v25  }
  0x43   :  { %204 = vperm.xlu1 %835, %v53_v26   ;;  %199 = vperm.xlu0 %834, %v52_v27  }
  0x4a   :  { %229 = vperm.xlu2 %836, %v58_v28  }
  0x4b   :  { %837 = vset.pattern.permute.xlu1 %v897_v30  ;;  %234 = vperm.xlu0 %834, %v59_v29  }
  0x4c   :  { %314 = vperm.xlu1 %837, %v1040_v18  }
  0x52   :  { %224 = vperm.xlu2 %836, %v57_v31  }
  0x53   :  { %214 = vperm.xlu0 %834, %v55_v32  }
  0x54   :  { %838 = vset.pattern.permute.xlu1 %v898_v33 }
  0x55   :  { %411 = vperm.xlu1 %838, %v1040_v18  }
  0x5a   :  { %840 = vset.pattern.permute.xlu2 %v898_v33 }
  0x5b   :  { %849 = vset.pattern.permute.xlu0 %v898_v33  ;;  %407 = vperm.xlu2 %840, %v42_v13  }
  0x5c   :  { %395 = vperm.xlu0 %849, %v1001_v10   ;;  %v83_v34 = vpop.permute.xlu2 %82 }
  0x5d   :  { %839 = vset.pattern.permute.xlu1 %v897_v30  ;;  %v145_v52 = vmul.f32 %v1123_v46, %v83_v34 }
  0x5e   :  { %306 = vperm.xlu1 %839, %v1022_v14  }
  0x63   :  { %842 = vset.pattern.permute.xlu2 %v897_v30 }
  0x64   :  { %375 = vperm.xlu0 %849, %v993_v9   ;;  %302 = vperm.xlu2 %842, %v1027_v15   ;;  %v1094_v35 = vpop.permute.xlu2 %87 }
  0x65   :  { %v146_v23 = vmul.f32 %v1123_v46, %v1094_v35 }
  0x66   :  { %841 = vset.pattern.permute.xlu1 %v896_v3 }
  0x67   :  { %219 = vperm.xlu1 %841, %v56_v36  }
  0x6c   :  { %856 = vset.pattern.permute.xlu0 %v897_v30  ;;  %844 = vset.pattern.permute.xlu2 %v899_v37  ;;  %v1102_v38 = vpop.permute.xlu2 %102 }
  0x6d   :  { %310 = vperm.xlu0 %856, %v42_v13   ;;  %504 = vperm.xlu2 %844, %v42_v13   ;;  %v149_v31 = vmul.f32 %v1123_v46, %v1102_v38 }
  0x6f   :  { %843 = vset.pattern.permute.xlu1 %v898_v33 }
  0x70   :  { %403 = vperm.xlu1 %843, %v1022_v14  }
  0x74   :  { %v1106_v39 = vpop.permute.xlu2 %117 }
  0x75   :  { %v73_v40 = vpop.permute.xlu1 %72  ;;  %286 = vperm.xlu0 %856, %v983_v7   ;;  %v63_v41 = vpop.permute.xlu0 %62  ;;  %846 = vset.pattern.permute.xlu2 %v898_v33 }
  0x76   :  { %399 = vperm.xlu2 %846, %v1027_v15   ;;  %v141_v62 = vmul.f32 %v1123_v46, %v63_v41 }
  0x78   :  { %845 = vset.pattern.permute.xlu1 %v897_v30 }
  0x79   :  { %298 = vperm.xlu1 %845, %v1001_v10  }
  0x7c   :  { %v1118_v43 = vpop.permute.xlu2 %132 }
  0x7d   :  { %v78_v44 = vpop.permute.xlu1 %77  ;;  %266 = vperm.xlu0 %856, %v970_v5   ;;  %v68_v45 = vpop.permute.xlu0 %67 }
  0x7e   :  { %848 = vset.pattern.permute.xlu2 %v897_v30  ;;  %v142_v47 = vmul.f32 %v1123_v46, %v68_v45 }
  0x7f   :  { %294 = vperm.xlu2 %848, %v1006_v11  }
  0x81   :  { %847 = vset.pattern.permute.xlu1 %v899_v37 }
  0x82   :  { %500 = vperm.xlu1 %847, %v1022_v14  }
  0x84   :  { %v165_v48 = vpop.permute.xlu2 %164 }
  0x85   :  { %v1129_v49 = vadd.f32 %v165_v48, %v142_v47  ;;  %v98_v50 = vpop.permute.xlu1 %97  ;;  %859 = vset.pattern.permute.xlu0 %v899_v37  ;;  %v93_v51 = vpop.permute.xlu0 %92 }
  0x86   :  { %508 = vperm.xlu0 %859, %v1040_v18   ;;  %v148_v57 = vmul.f32 %v1123_v46, %v98_v50  ;;  %v147_v22 = vmul.f32 %v1123_v46, %v93_v51 }
  0x87   :  { %290 = vperm.xlu2 %848, %v1011_v12  }
  0x8a   :  { %496 = vperm.xlu1 %847, %v1027_v15  }
  0x8c   :  { %v180_v53 = vpop.permute.xlu2 %179 }
  0x8d   :  { %v1136_v54 = vadd.f32 %v180_v53, %v145_v52  ;;  %v113_v55 = vpop.permute.xlu1 %112  ;;  %v108_v56 = vpop.permute.xlu0 %107 }
  0x8e   :  { %484 = vperm.xlu0 %859, %v1011_v12   ;;  %v151_v63 = vmul.f32 %v1123_v46, %v113_v55  ;;  %v150_v29 = vmul.f32 %v1123_v46, %v108_v56 }
  0x8f   :  { %851 = vset.pattern.permute.xlu2 %v899_v37 }
  0x90   :  { %492 = vperm.xlu2 %851, %v1001_v10  }
  0x92   :  { %850 = vset.pattern.permute.xlu1 %v898_v33 }
  0x93   :  { %391 = vperm.xlu1 %850, %v1006_v11  }
  0x94   :  { %v195_v58 = vpop.permute.xlu2 %194 }
  0x95   :  { %v1144_v59 = vadd.f32 %v195_v58, %v148_v57  ;;  %v1146_v60 = vpop.permute.xlu1 %127  ;;  %v1148_v61 = vpop.permute.xlu0 %122  ;;  %v1225_v57 = vperm.slane %v1116_v42, 1 }
  0x96   :  { %464 = vperm.xlu0 %859, %v944_v0  }
  0x98   :  { %488 = vperm.xlu2 %851, %v1006_v11   ;;  %v143_v11 = vmul.f32 %v1123_v46, %v73_v40 }
  0x9b   :  { %387 = vperm.xlu1 %850, %v1011_v12   ;;  %v144_v12 = vmul.f32 %v1123_v46, %v78_v44 }
  0x9c   :  { %v210_v10 = vpop.permute.xlu2 %209 }
  0x9d   :  { %v1155_v13 = vadd.f32 %v210_v10, %v151_v63  ;;  %v160_v14 = vpop.permute.xlu1 %159  ;;  %v1157_v15 = vpop.permute.xlu0 %137  ;;  %v1235_v10 = vperm.slane %v1116_v42, 2 }
  0x9e   :  { %v1159_v16 = vadd.f32 %v160_v14, %v141_v62  ;;  %864 = vset.pattern.permute.xlu0 %v898_v33  ;;  %v156_v58 = vmul.f32 %v1123_v46, %v1157_v15  ;;  %v153_v15 = vmul.f32 %v1123_v46, %v1148_v61  ;;  %v152_v61 = vmul.f32 %v1123_v46, %v1106_v39 }
  0x9f   :  { %355 = vperm.xlu0 %864, %v975_v6  }
  0xa0   :  { %853 = vset.pattern.permute.xlu2 %v898_v33 }
  0xa1   :  { %383 = vperm.xlu2 %853, %v983_v7  }
  0xa3   :  { %852 = vset.pattern.permute.xlu1 %v897_v30 }
  0xa4   :  { %282 = vperm.xlu1 %852, %v988_v8   ;;  %v1169_v17 = vpop.permute.xlu2 %229 }
  0xa5   :  { %v175_v18 = vpop.permute.xlu1 %174  ;;  %v170_v19 = vpop.permute.xlu0 %169 }
  0xa6   :  { %v1171_v20 = vadd.f32 %v175_v18, %v144_v12  ;;  %v1173_v21 = vadd.f32 %v170_v19, %v143_v11  ;;  %v1247_v18 = vperm.slane %v1116_v42, 3 }
  0xa7   :  { %867 = vset.pattern.permute.xlu0 %v896_v3 }
  0xa9   :  { %379 = vperm.xlu2 %853, %v988_v8  }
  0xac   :  { %278 = vperm.xlu1 %852, %v993_v9   ;;  %v1181_v26 = vpop.permute.xlu2 %224 }
  0xad   :  { %v190_v24 = vpop.permute.xlu1 %189  ;;  %v185_v25 = vpop.permute.xlu0 %184 }
  0xae   :  { %v1183_v27 = vadd.f32 %v190_v24, %v147_v22  ;;  %v1185_v28 = vadd.f32 %v185_v25, %v146_v23  ;;  %v154_v22 = vmul.f32 %v1123_v46, %v1146_v60 }
  0xb1   :  { %855 = vset.pattern.permute.xlu2 %v897_v30 }
  0xb2   :  { %274 = vperm.xlu2 %855, %v965_v4  }
  0xb4   :  { %854 = vset.pattern.permute.xlu1 %v899_v37 }
  0xb5   :  { %480 = vperm.xlu1 %854, %v983_v7   ;;  %v205_v32 = vpop.permute.xlu1 %204  ;;  %v200_v34 = vpop.permute.xlu0 %199 }
  0xb6   :  { %v1194_v35 = vadd.f32 %v205_v32, %v150_v29  ;;  %v1196_v36 = vadd.f32 %v200_v34, %v149_v31  ;;  %v408_v40 = vpop.permute.xlu2 %407  ;;  %v250_v29 = vadd.f32 %v1181_v26, %v154_v22 }
  0xb7   :  { %v429_v25 = vmul.f32 %v1235_v10, %v408_v40 }
  0xba   :  { %270 = vperm.xlu2 %855, %v944_v0  }
  0xbd   :  { %476 = vperm.xlu1 %854, %v988_v8   ;;  %v235_v41 = vpop.permute.xlu0 %234 }
  0xbe   :  { %v315_v44 = vpop.permute.xlu1 %314  ;;  %v303_v45 = vpop.permute.xlu2 %302  ;;  %v252_v11 = vadd.f32 %v235_v41, %v156_v58 }
  0xbf   :  { %v333_v12 = vmul.f32 %v1225_v57, %v315_v44 }
  0xc1   :  { %v349_v31 = vadd.f32 %v333_v12, %v252_v11 }
  0xc2   :  { %858 = vset.pattern.permute.xlu2 %v899_v37 }
  0xc3   :  { %472 = vperm.xlu2 %858, %v993_v9  }
  0xc5   :  { %857 = vset.pattern.permute.xlu1 %v898_v33  ;;  %v215_v7 = vpop.permute.xlu0 %214 }
  0xc6   :  { %371 = vperm.xlu1 %857, %v965_v4   ;;  %v248_v60 = vadd.f32 %v215_v7, %v152_v61 }
  0xc7   :  { %v412_v38 = vpop.permute.xlu1 %411  ;;  %v505_v47 = vpop.permute.xlu2 %504 }
  0xc8   :  { %v526_v32 = vmul.f32 %v1247_v18, %v505_v47 }
  0xcb   :  { %468 = vperm.xlu2 %858, %v965_v4  }
  0xce   :  { %367 = vperm.xlu1 %857, %v944_v0   ;;  %v396_v48 = vpop.permute.xlu0 %395 }
  0xd0   :  { %v307_v8 = vpop.permute.xlu1 %306  ;;  %v400_v50 = vpop.permute.xlu2 %399 }
  0xd1   :  { %v427_v40 = vmul.f32 %v1235_v10, %v400_v50 }
  0xd3   :  { %861 = vset.pattern.permute.xlu2 %v898_v33 }
  0xd4   :  { %363 = vperm.xlu2 %861, %v970_v5  }
  0xd6   :  { %860 = vset.pattern.permute.xlu1 %v897_v30  ;;  %v1209_v9 = vpop.permute.xlu0 %375 }
  0xd7   :  { %262 = vperm.xlu1 %860, %v949_v1  }
  0xd9   :  { %v220_v51 = vpop.permute.xlu1 %219  ;;  %v1213_v52 = vpop.permute.xlu2 %294 }
  0xda   :  { %v249_v23 = vadd.f32 %v220_v51, %v153_v15 }
  0xdc   :  { %359 = vperm.xlu2 %861, %v949_v1  }
  0xdf   :  { %258 = vperm.xlu1 %860, %v975_v6   ;;  %v311_v0 = vpop.permute.xlu0 %310 }
  0xe0   :  { %v332_v62 = vmul.f32 %v1225_v57, %v311_v0 }
  0xe1   :  { %v1221_v55 = vpop.permute.xlu2 %290 }
  0xe2   :  { %v404_v4 = vpop.permute.xlu1 %403 }
  0xe3   :  { %v428_v41 = vmul.f32 %v1235_v10, %v404_v4 }
  0xe4   :  { %863 = vset.pattern.permute.xlu2 %v897_v30  ;;  %v155_v30 = vmul.f32 %v1123_v46, %v1118_v43  ;;  %v426_v46 = vmul.f32 %v1235_v10, %v396_v48 }
  0xe5   :  { %254 = vperm.xlu2 %863, %v954_v2  }
  0xe7   :  { %862 = vset.pattern.permute.xlu1 %v899_v37  ;;  %v1219_v53 = vpop.permute.xlu0 %286 }
  0xe8   :  { %460 = vperm.xlu1 %862, %v970_v5  }
  0xea   :  { %v493_v5 = vpop.permute.xlu2 %492 }
  0xeb   :  { %v299_v56 = vpop.permute.xlu1 %298 }
  0xec   :  { %v329_v42 = vmul.f32 %v1225_v57, %v299_v56 }
  0xed   :  { %865 = vset.pattern.permute.xlu2 %v898_v33  ;;  %v251_v33 = vadd.f32 %v1169_v17, %v155_v30  ;;  %v430_v17 = vmul.f32 %v1235_v10, %v412_v38 }
  0xee   :  { %351 = vperm.xlu2 %865, %v954_v2   ;;  %v345_v38 = vadd.f32 %v329_v42, %v248_v60 }
  0xef   :  { %v267_v63 = vpop.permute.xlu0 %266  ;;  %v348_v19 = vadd.f32 %v332_v62, %v251_v33  ;;  %v446_v39 = vadd.f32 %v430_v17, %v349_v31 }
  0xf0   :  { %v321_v14 = vmul.f32 %v1225_v57, %v267_v63  ;;  %456 = vperm.xlu1 %862, %v949_v1   ;;  %v330_v1 = vmul.f32 %v1225_v57, %v303_v45  ;;  %v442_v56 = vadd.f32 %v426_v46, %v345_v38  ;;  %v326_v46 = vmul.f32 %v1225_v57, %v1219_v53 }
  0xf1   :  { %v445_v34 = vadd.f32 %v429_v25, %v348_v19 }
  0xf2   :  { %v1244_v43 = vadd.f32 %v321_v14, %v1171_v20  ;;  %v331_v20 = vmul.f32 %v1225_v57, %v307_v8  ;;  %v346_v44 = vadd.f32 %v330_v1, %v249_v23  ;;  %v489_v47 = vpop.permute.xlu2 %488 }
  0xf3   :  { %v542_v0 = vadd.f32 %v526_v32, %v445_v34 }
  0xf4   :  { %v501_v24 = vpop.permute.xlu1 %500  ;;  %v347_v45 = vadd.f32 %v331_v20, %v250_v29  ;;  %v443_v48 = vadd.f32 %v427_v40, %v346_v44 }
  0xf5   :  { %v558_v62 = vmax.f32 %v542_v0, 0.0 }
  0xf6   :  { %866 = vset.pattern.permute.xlu2 %v899_v37  ;;  %v525_v37 = vmul.f32 %v1247_v18, %v501_v24  ;;  %v444_v8 = vadd.f32 %v428_v41, %v347_v45  ;;  %v342_v45 = vadd.f32 %v326_v46, %v1196_v36 }
  0xf7   :  { %448 = vperm.xlu2 %866, %v954_v2   ;;  %v523_v2 = vmul.f32 %v1247_v18, %v493_v5  ;;  %v328_v5 = vmul.f32 %v1225_v57, %v1213_v52  ;;  %v522_v52 = vmul.f32 %v1247_v18, %v489_v47 }
  0xf8   :  { %452 = vperm.xlu1 %862, %v975_v6   ;;  %v509_v26 = vpop.permute.xlu0 %508  ;;  %v541_v50 = vadd.f32 %v525_v37, %v444_v8 }
  0xf9   :  { %v527_v7 = vmul.f32 %v1247_v18, %v509_v26  ;;  %v539_v63 = vadd.f32 %v523_v2, %v442_v56  ;;  %v344_v19 = vadd.f32 %v328_v5, %v1155_v13 }
  0xfa   :  { %v557_v14 = vmax.f32 %v541_v50, 0.0 }
  0xfb   :  { %v543_v51 = vadd.f32 %v527_v7, %v446_v39  ;;  %v384_v15 = vpop.permute.xlu2 %383  ;;  %v555_v11 = vmax.f32 %v539_v63, 0.0 }
  0xfc   :  { %v497_v4 = vpop.permute.xlu1 %496  ;;  %v423_v26 = vmul.f32 %v1235_v10, %v384_v15 }
  0xfd   :  { %v559_v58 = vmax.f32 %v543_v51, 0.0  ;;  %v524_v6 = vmul.f32 %v1247_v18, %v497_v4 }
  0xfe   :  { %v439_v37 = vadd.f32 %v423_v26, %v342_v45 }
  0xff   :  { %v540_v30 = vadd.f32 %v524_v6, %v443_v48  ;;  %672 = vmatpush.msra.mxu0 %v559_v58  ;;  %797 = vmatpush.msra.mxu2 %v559_v58 }
 0x100   :  { %798 = vmatpush.msra.mxu3 %v559_v58  ;;  %868 = vset.pattern.permute.xlu1 %v896_v3  ;;  %v485_v23 = vpop.permute.xlu0 %484 }
 0x101   :  { %673 = vmatpush.msra.mxu0 %v558_v62  ;;  %799 = vmatpush.msra.mxu2 %v558_v62  ;;  %v556_v33 = vmax.f32 %v540_v30, 0.0  ;;  %v521_v42 = vmul.f32 %v1247_v18, %v485_v23 }
 0x102   :  { %800 = vmatpush.msra.mxu3 %v558_v62  ;;  %869 = vset.pattern.permute.xlu2 %v896_v3  ;;  %v327_v3 = vmul.f32 %v1225_v57, %v1221_v55 }
 0x103   :  { %674 = vmatpush.msra.mxu0 %v557_v14  ;;  %801 = vmatpush.msra.mxu2 %v557_v14  ;;  %v380_v20 = vpop.permute.xlu2 %379 }
 0x104   :  { %802 = vmatpush.msra.mxu3 %v557_v14  ;;  %v343_v25 = vadd.f32 %v327_v3, %v1194_v35  ;;  %v421_v35 = vmul.f32 %v1235_v10, %v1209_v9  ;;  %v422_v0 = vmul.f32 %v1235_v10, %v380_v20 }
 0x105   :  { %v392_v12 = vpop.permute.xlu1 %391  ;;  %675 = vmatpush.msra.mxu0 %v556_v33  ;;  %803 = vmatpush.msra.mxu2 %v556_v33 }
 0x106   :  { %v425_v22 = vmul.f32 %v1235_v10, %v392_v12  ;;  %804 = vmatpush.msra.mxu3 %v556_v33 }
 0x107   :  { %676 = vmatpush.msra.mxu0 %v555_v11  ;;  %805 = vmatpush.msra.mxu2 %v555_v11 }
 0x108   :  { %v441_v1 = vadd.f32 %v425_v22, %v344_v19  ;;  %806 = vmatpush.msra.mxu3 %v555_v11  ;;  %v465_v12 = vpop.permute.xlu0 %464 }
 0x10a   :  { %v538_v17 = vadd.f32 %v522_v52, %v441_v1 }
 0x10c   :  { %v554_v24 = vmax.f32 %v538_v17, 0.0  ;;  %v275_v55 = vpop.permute.xlu2 %274 }
 0x10d   :  { %v388_v61 = vpop.permute.xlu1 %387  ;;  %v323_v6 = vmul.f32 %v1225_v57, %v275_v55 }
 0x10e   :  { %v424_v13 = vmul.f32 %v1235_v10, %v388_v61  ;;  %677 = vmatpush.msra.mxu0 %v554_v24  ;;  %807 = vmatpush.msra.mxu2 %v554_v24 }
 0x10f   :  { %808 = vmatpush.msra.mxu3 %v554_v24  ;;  %v339_v62 = vadd.f32 %v323_v6, %v1185_v28  ;;  %v516_v28 = vmul.f32 %v1247_v18, %v465_v12  ;;  %v583_v6 = vld [vmem:[%s1428_s4 + $0x38] sm:$0xff] }
 0x110   :  { %v440_v29 = vadd.f32 %v424_v13, %v343_v25  ;;  %v587_v12 = vld [vmem:[%s1428_s4 + $0x58] sm:$0xff] }
 0x111   :  { %v356_v26 = vpop.permute.xlu0 %355 }
 0x112   :  { %v537_v31 = vadd.f32 %v521_v42, %v440_v29 }
 0x114   :  { %v553_v60 = vmax.f32 %v537_v31, 0.0  ;;  %v271_v40 = vpop.permute.xlu2 %270 }
 0x115   :  { %v322_v33 = vmul.f32 %v1225_v57, %v271_v40 }
 0x116   :  { %v283_v32 = vpop.permute.xlu1 %282  ;;  %678 = vmatpush.msra.mxu0 %v553_v60  ;;  %809 = vmatpush.msra.mxu2 %v553_v60 }
 0x117   :  { %810 = vmatpush.msra.mxu3 %v553_v60  ;;  %v325_v7 = vmul.f32 %v1225_v57, %v283_v32  ;;  %v338_v52 = vadd.f32 %v322_v33, %v1136_v54  ;;  %v590_v54 = vld [vmem:[%s1428_s4 + $0x70] sm:$0xff] }
 0x118   :  { %664 = vperm.xlu1 %868, %v590_v54   ;;  %v566_v33 = vld [vmem:[%s1427_s3 + $0x30] sm:$0xff]  ;;  %v754_v54 = vld [vmem:[%s1430_s6] sm:$0xff]  ;;  %s900_s6 = smov [#allocation2]  }
 0x119   :  { %v341_v51 = vadd.f32 %v325_v7, %v1144_v59  ;;  %s786_s8 = sshll.u32 %s900_s6, 4  ;;  %s787_s8 = int_to_ptr.vmem [resolvable:$true] %s786_s8 }
 0x11b   :  { %v438_v36 = vadd.f32 %v422_v0, %v341_v51 }
 0x11d   :  { %v473_v9 = vpop.permute.xlu2 %472 }
 0x11e   :  { %v279_v34 = vpop.permute.xlu1 %278  ;;  %v518_v53 = vmul.f32 %v1247_v18, %v473_v9 }
 0x11f   :  { %v324_v41 = vmul.f32 %v1225_v57, %v279_v34  ;;  %v588_v34 = vld [vmem:[%s1428_s4 + $0x60] sm:$0xff] }
 0x120   :  { %654 = vperm.xlu1 %868, %v588_v34  }
 0x121   :  { %v340_v39 = vadd.f32 %v324_v41, %v1183_v27 }
 0x123   :  { %v437_v44 = vadd.f32 %v421_v35, %v340_v39 }
 0x125   :  { %v534_v48 = vadd.f32 %v518_v53, %v437_v44  ;;  %v469_v50 = vpop.permute.xlu2 %468 }
 0x126   :  { %v517_v14 = vmul.f32 %v1247_v18, %v469_v50  ;;  %v560_v50 = vld [vmem:[%s1427_s3] sm:$0xff] }
 0x127   :  { %v481_v38 = vpop.permute.xlu1 %480  ;;  %v550_v30 = vmax.f32 %v534_v48, 0.0 }
 0x128   :  { %v520_v47 = vmul.f32 %v1247_v18, %v481_v38 }
 0x12a   :  { %v536_v8 = vadd.f32 %v520_v47, %v439_v37  ;;  %v591_v37 = vld [vmem:[%s1428_s4 + $0x78] sm:$0xff] }
 0x12b   :  { %669 = vperm.xlu0 %867, %v591_v37  }
 0x12c   :  { %v552_v27 = vmax.f32 %v536_v8, 0.0  ;;  %v416_v8 = vmul.f32 %v1235_v10, %v356_v26 }
 0x12e   :  { %679 = vmatpush.msra.mxu0 %v552_v27  ;;  %811 = vmatpush.msra.mxu2 %v552_v27  ;;  %v364_v11 = vpop.permute.xlu2 %363 }
 0x12f   :  { %812 = vmatpush.msra.mxu3 %v552_v27  ;;  %v477_v2 = vpop.permute.xlu1 %476  ;;  %v418_v13 = vmul.f32 %v1235_v10, %v364_v11  ;;  %v562_v11 = vld [vmem:[%s1427_s3 + $0x10] sm:$0xff] }
 0x130   :  { %v519_v4 = vmul.f32 %v1247_v18, %v477_v2 }
 0x131   :  { %v434_v29 = vadd.f32 %v418_v13, %v1244_v43 }
 0x132   :  { %v535_v56 = vadd.f32 %v519_v4, %v438_v36 }
 0x134   :  { %v551_v58 = vmax.f32 %v535_v56, 0.0 }
 0x136   :  { %680 = vmatpush.msra.mxu0 %v551_v58  ;;  %813 = vmatpush.msra.mxu2 %v551_v58  ;;  %v360_v24 = vpop.permute.xlu2 %359 }
 0x137   :  { %814 = vmatpush.msra.mxu3 %v551_v58  ;;  %v417_v39 = vmul.f32 %v1235_v10, %v360_v24  ;;  %v582_v58 = vld [vmem:[%s1428_s4 + $0x30] sm:$0xff]  ;;  %v581_v24 = vld [vmem:[%s1428_s4 + $0x28] sm:$0xff] }
 0x138   :  { %v372_v59 = vpop.permute.xlu1 %371  ;;  %681 = vmatpush.msra.mxu0 %v550_v30  ;;  %815 = vmatpush.msra.mxu2 %v550_v30 }
 0x139   :  { %v420_v63 = vmul.f32 %v1235_v10, %v372_v59  ;;  %816 = vmatpush.msra.mxu3 %v550_v30  ;;  %v565_v30 = vld [vmem:[%s1427_s3 + $0x28] sm:$0xff]  ;;  %v570_v59 = vld [vmem:[%s1427_s3 + $0x50] sm:$0xff] }
 0x13b   :  { %v436_v5 = vadd.f32 %v420_v63, %v339_v62  ;;  %v561_v62 = vld [vmem:[%s1427_s3 + $0x8] sm:$0xff] }
 0x13c   :  { %v589_v63 = vld [vmem:[%s1428_s4 + $0x68] sm:$0xff] }
 0x13d   :  { %v533_v15 = vadd.f32 %v517_v14, %v436_v5  ;;  %659 = vperm.xlu2 %869, %v589_v63   ;;  %v579_v14 = vld [vmem:[%s1428_s4 + $0x18] sm:$0xff]  ;;  %v580_v5 = vld [vmem:[%s1428_s4 + $0x20] sm:$0xff] }
 0x13f   :  { %v549_v19 = vmax.f32 %v533_v15, 0.0  ;;  %v255_v20 = vpop.permute.xlu2 %254  ;;  %v571_v15 = vld [vmem:[%s1427_s3 + $0x58] sm:$0xff] }
 0x140   :  { %v368_v22 = vpop.permute.xlu1 %367  ;;  %v318_v45 = vmul.f32 %v1225_v57, %v255_v20  ;;  %v575_v20 = vld [vmem:[%s1427_s3 + $0x78] sm:$0xff] }
 0x141   :  { %v419_v1 = vmul.f32 %v1235_v10, %v368_v22  ;;  %682 = vmatpush.msra.mxu0 %v549_v19  ;;  %817 = vmatpush.msra.mxu2 %v549_v19  ;;  %v577_v22 = vld [vmem:[%s1428_s4 + $0x8] sm:$0xff] }
 0x142   :  { %818 = vmatpush.msra.mxu3 %v549_v19  ;;  %v576_v19 = vld [vmem:[%s1428_s4] sm:$0xff] }
 0x143   :  { %v435_v3 = vadd.f32 %v419_v1, %v338_v52  ;;  %v567_v52 = vld [vmem:[%s1427_s3 + $0x38] sm:$0xff]  ;;  %v572_v1 = vld [vmem:[%s1427_s3 + $0x60] sm:$0xff] }
 0x145   :  { %v532_v17 = vadd.f32 %v516_v28, %v435_v3  ;;  %649 = vperm.xlu2 %869, %v587_v12   ;;  %v563_v28 = vld [vmem:[%s1427_s3 + $0x18] sm:$0xff]  ;;  %v584_v3 = vld [vmem:[%s1428_s4 + $0x40] sm:$0xff] }
 0x147   :  { %v548_v23 = vmax.f32 %v532_v17, 0.0  ;;  %v568_v17 = vld [vmem:[%s1427_s3 + $0x40] sm:$0xff] }
 0x148   :  { %v352_v32 = vpop.permute.xlu2 %351 }
 0x149   :  { %v263_v61 = vpop.permute.xlu1 %262  ;;  %683 = vmatpush.msra.mxu0 %v548_v23  ;;  %819 = vmatpush.msra.mxu2 %v548_v23  ;;  %v415_v47 = vmul.f32 %v1235_v10, %v352_v32 }
 0x14a   :  { %820 = vmatpush.msra.mxu3 %v548_v23  ;;  %v320_v31 = vmul.f32 %v1225_v57, %v263_v61  ;;  %v573_v23 = vld [vmem:[%s1427_s3 + $0x68] sm:$0xff]  ;;  %v574_v61 = vld [vmem:[%s1427_s3 + $0x70] sm:$0xff] }
 0x14c   :  { %v336_v35 = vadd.f32 %v320_v31, %v1173_v21  ;;  %v585_v21 = vld [vmem:[%s1428_s4 + $0x48] sm:$0xff] }
 0x14d   :  { %639 = vperm.xlu1 %868, %v585_v21   ;;  %634 = vperm.xlu2 %869, %v584_v3  }
 0x14e   :  { %v433_v40 = vadd.f32 %v417_v39, %v336_v35 }
 0x151   :  { %v259_v25 = vpop.permute.xlu1 %258  ;;  %v449_v7 = vpop.permute.xlu2 %448 }
 0x152   :  { %v319_v46 = vmul.f32 %v1225_v57, %v259_v25  ;;  %v334_v57 = vadd.f32 %v318_v45, %v1159_v16  ;;  %v512_v27 = vmul.f32 %v1247_v18, %v449_v7  ;;  %v564_v16 = vld [vmem:[%s1427_s3 + $0x20] sm:$0xff]  ;;  %v578_v25 = vld [vmem:[%s1428_s4 + $0x10] sm:$0xff] }
 0x154   :  { %v335_v9 = vadd.f32 %v319_v46, %v1129_v49  ;;  %v431_v53 = vadd.f32 %v415_v47, %v334_v57  ;;  %v586_v49 = vld [vmem:[%s1428_s4 + $0x50] sm:$0xff] }
 0x155   :  { %644 = vperm.xlu0 %867, %v586_v49   ;;  %624 = vperm.xlu1 %868, %v582_v58  }
 0x156   :  { %v432_v2 = vadd.f32 %v416_v8, %v335_v9  ;;  %v528_v4 = vadd.f32 %v512_v27, %v431_v53  ;;  %619 = vperm.xlu2 %869, %v581_v24  }
 0x158   :  { %v544_v56 = vmax.f32 %v528_v4, 0.0 }
 0x15a   :  { %v461_v42 = vpop.permute.xlu1 %460 }
 0x15b   :  { %v515_v60 = vmul.f32 %v1247_v18, %v461_v42 }
 0x15d   :  { %v531_v55 = vadd.f32 %v515_v60, %v434_v29  ;;  %629 = vperm.xlu0 %867, %v583_v6   ;;  %609 = vperm.xlu1 %868, %v579_v14  }
 0x15e   :  { %604 = vperm.xlu2 %869, %v578_v25  }
 0x15f   :  { %v547_v41 = vmax.f32 %v531_v55, 0.0 }
 0x161   :  { %684 = vmatpush.msra.mxu0 %v547_v41  ;;  %821 = vmatpush.msra.mxu2 %v547_v41 }
 0x162   :  { %822 = vmatpush.msra.mxu3 %v547_v41  ;;  %v457_v43 = vpop.permute.xlu1 %456 }
 0x163   :  { %v514_v44 = vmul.f32 %v1247_v18, %v457_v43 }
 0x165   :  { %v530_v38 = vadd.f32 %v514_v44, %v433_v40  ;;  %614 = vperm.xlu0 %867, %v580_v5   ;;  %594 = vperm.xlu1 %868, %v576_v19  }
 0x166   :  { %757 = vperm.xlu2 %869, %v754_v54  }
 0x167   :  { %v546_v51 = vmax.f32 %v530_v38, 0.0 }
 0x169   :  { %685 = vmatpush.msra.mxu0 %v546_v51  ;;  %823 = vmatpush.msra.mxu2 %v546_v51 }
 0x16a   :  { %824 = vmatpush.msra.mxu3 %v546_v51  ;;  %v453_v0 = vpop.permute.xlu1 %452 }
 0x16b   :  { %v513_v36 = vmul.f32 %v1247_v18, %v453_v0  ;;  %v569_v18 = vld [vmem:[%s1427_s3 + $0x48] sm:$0xff] }
 0x16d   :  { %v529_v48 = vadd.f32 %v513_v36, %v432_v2  ;;  %599 = vperm.xlu0 %867, %v577_v22  }
 0x16f   :  { %v545_v10 = vmax.f32 %v529_v48, 0.0 }
 0x171   :  { %686 = vmatpush.msra.mxu0 %v545_v10  ;;  %825 = vmatpush.msra.mxu2 %v545_v10 }
 0x172   :  { %826 = vmatpush.msra.mxu3 %v545_v10 }
 0x173   :  { %687 = vmatpush.msra.mxu0 %v544_v56  ;;  %827 = vmatpush.msra.mxu2 %v544_v56 }
 0x174   :  { %828 = vmatpush.msra.mxu3 %v544_v56  ;;  %700 = vmatmul.f32.vlgmr.msra.gmra.mxu2 %v564_v16 }
 0x175   :  { %715 = vmatmul.f32.vlgmr.msra.gmra.mxu3 %v569_v18  ;;  %688 = vmatmul.f32.vlgmr.msra.gmra.mxu0 %v560_v50 }
 0x17c   :  { %703 = vmatmul.f32.gmra.mxu2 %v565_v30 }
 0x17d   :  { %718 = vmatmul.f32.gmra.mxu3 %v570_v59  ;;  %691 = vmatmul.f32.gmra.mxu0 %v561_v62 }
 0x184   :  { %706 = vmatmul.f32.gmra.mxu2 %v566_v33 }
 0x185   :  { %721 = vmatmul.f32.gmra.mxu3 %v571_v15  ;;  %694 = vmatmul.f32.gmra.mxu0 %v562_v11 }
 0x18a   :  { %v665_v32 = vpop.permute.xlu1 %664 }
 0x18c   :  { %709 = vmatmul.f32.gmra.mxu2 %v567_v52 }
 0x18d   :  { %724 = vmatmul.f32.gmra.mxu3 %v572_v1  ;;  %697 = vmatmul.f32.gmra.mxu0 %v563_v28 }
 0x192   :  { %v655_v41 = vpop.permute.xlu1 %654 }
 0x194   :  { %712 = vmatmul.f32.gmra.mxu2 %v568_v17 }
 0x195   :  { %727 = vmatmul.f32.gmra.mxu3 %v573_v23 }
 0x197   :  { %v660_v34 = vpop.permute.xlu2 %659 }
 0x19d   :  { %730 = vmatmul.f32.gmra.mxu3 %v574_v61  ;;  %v670_v39 = vpop.permute.xlu0 %669 }
 0x19f   :  { %v650_v44 = vpop.permute.xlu2 %649 }
 0x1a5   :  { %733 = vmatmul.f32.gmra.mxu3 %v575_v20 }
 0x1a7   :  { %v635_v51 = vpop.permute.xlu2 %634 }
 0x1b0   :  { %v620_v58 = vpop.permute.xlu2 %619 }
 0x1b8   :  { %v605_v52 = vpop.permute.xlu2 %604 }
 0x1bf   :  { %v640_v26 = vpop.permute.xlu1 %639 }
 0x1c7   :  { %v645_v45 = vpop.permute.xlu0 %644  ;;  %v625_v0 = vpop.permute.xlu1 %624 }
 0x1cf   :  { %v630_v53 = vpop.permute.xlu0 %629  ;;  %v610_v59 = vpop.permute.xlu1 %609 }
 0x1d7   :  { %v615_v62 = vpop.permute.xlu0 %614  ;;  %v595_v17 = vpop.permute.xlu1 %594 }
 0x1df   :  { %v600_v1 = vpop.permute.xlu0 %599 }
 0x1f2   :  { %v689_v43 = vpop.f32.mrf.mxu0 }
 0x1f3   :  { %v690_v25 = vadd.f32 %v689_v43, %v595_v17 }
 0x1f5   :  { %v737_v54 = vmax.f32 %v690_v25, 0.0 }
 0x1f7   :  { %v701_v31 = vpop.f32.mrf.mxu2 }
 0x1f8   :  { %v716_v13 = vpop.f32.mrf.mxu3  ;;  %v702_v12 = vadd.f32 %v701_v31, %v615_v62 }
 0x1f9   :  { %v717_v56 = vadd.f32 %v716_v13, %v640_v26  ;;  %v753_v13 = vld [vmem:[%s1429_s5] sm:$0xff] }
 0x1fa   :  { %v692_v38 = vpop.f32.mrf.mxu0  ;;  %v741_v28 = vmax.f32 %v702_v12, 0.0 }
 0x1fb   :  { %v746_v6 = vmax.f32 %v717_v56, 0.0  ;;  %v693_v24 = vadd.f32 %v692_v38, %v600_v1 }
 0x1fd   :  { %v738_v20 = vmax.f32 %v693_v24, 0.0 }
 0x1ff   :  { %v704_v55 = vpop.f32.mrf.mxu2 }
 0x200   :  { %v719_v42 = vpop.f32.mrf.mxu3  ;;  %v705_v5 = vadd.f32 %v704_v55, %v620_v58 }
 0x201   :  { %v720_v4 = vadd.f32 %v719_v42, %v645_v45  ;;  %v758_v42 = vpop.permute.xlu2 %757 }
 0x202   :  { %v695_v49 = vpop.f32.mrf.mxu0  ;;  %v742_v19 = vmax.f32 %v705_v5, 0.0 }
 0x203   :  { %v747_v18 = vmax.f32 %v720_v4, 0.0  ;;  %v696_v3 = vadd.f32 %v695_v49, %v605_v52 }
 0x205   :  { %v739_v61 = vmax.f32 %v696_v3, 0.0 }
 0x207   :  { %v707_v46 = vpop.f32.mrf.mxu2 }
 0x208   :  { %v722_v29 = vpop.f32.mrf.mxu3  ;;  %v708_v63 = vadd.f32 %v707_v46, %v625_v0 }
 0x209   :  { %v723_v2 = vadd.f32 %v722_v29, %v650_v44 }
 0x20a   :  { %v698_v15 = vpop.f32.mrf.mxu0  ;;  %v743_v11 = vmax.f32 %v708_v63, 0.0 }
 0x20b   :  { %v748_v16 = vmax.f32 %v723_v2, 0.0  ;;  %v699_v22 = vadd.f32 %v698_v15, %v610_v59 }
 0x20d   :  { %v740_v23 = vmax.f32 %v699_v22, 0.0 }
 0x20f   :  { %v710_v21 = vpop.f32.mrf.mxu2 }
 0x210   :  { %v725_v60 = vpop.f32.mrf.mxu3  ;;  %v711_v30 = vadd.f32 %v710_v21, %v630_v53 }
 0x211   :  { %v726_v57 = vadd.f32 %v725_v60, %v655_v41 }
 0x212   :  { %v744_v33 = vmax.f32 %v711_v30, 0.0 }
 0x213   :  { %v749_v48 = vmax.f32 %v726_v57, 0.0 }
 0x217   :  { %v713_v10 = vpop.f32.mrf.mxu2 }
 0x218   :  { %v728_v35 = vpop.f32.mrf.mxu3  ;;  %v714_v50 = vadd.f32 %v713_v10, %v635_v51 }
 0x219   :  { %v729_v9 = vadd.f32 %v728_v35, %v660_v34 }
 0x21a   :  { %v745_v14 = vmax.f32 %v714_v50, 0.0 }
 0x21b   :  { %v750_v36 = vmax.f32 %v729_v9, 0.0 }
 0x220   :  { %v731_v40 = vpop.f32.mrf.mxu3 }
 0x221   :  { %v732_v7 = vadd.f32 %v731_v40, %v665_v32 }
 0x223   :  { %v751_v27 = vmax.f32 %v732_v7, 0.0 }
 0x228   :  { %v734_v37 = vpop.f32.mrf.mxu3 }
 0x229   :  { %v735_v47 = vadd.f32 %v734_v37, %v670_v39 }
 0x22b   :  { %v752_v8 = vmax.f32 %v735_v47, 0.0 }
 0x22d   :  { %760 = vmatpush.msra.mxu1 %v752_v8 }
 0x22f   :  { %761 = vmatpush.msra.mxu1 %v751_v27 }
 0x231   :  { %762 = vmatpush.msra.mxu1 %v750_v36 }
 0x233   :  { %763 = vmatpush.msra.mxu1 %v749_v48 }
 0x235   :  { %764 = vmatpush.msra.mxu1 %v748_v16 }
 0x237   :  { %765 = vmatpush.msra.mxu1 %v747_v18 }
 0x239   :  { %766 = vmatpush.msra.mxu1 %v746_v6 }
 0x23b   :  { %767 = vmatpush.msra.mxu1 %v745_v14 }
 0x23d   :  { %768 = vmatpush.msra.mxu1 %v744_v33 }
 0x23f   :  { %769 = vmatpush.msra.mxu1 %v743_v11 }
 0x241   :  { %770 = vmatpush.msra.mxu1 %v742_v19 }
 0x243   :  { %771 = vmatpush.msra.mxu1 %v741_v28 }
 0x245   :  { %772 = vmatpush.msra.mxu1 %v740_v23 }
 0x247   :  { %773 = vmatpush.msra.mxu1 %v739_v61 }
 0x249   :  { %774 = vmatpush.msra.mxu1 %v738_v20 }
 0x24b   :  { %775 = vmatpush.msra.mxu1 %v737_v54 }
 0x24c   :  { %776 = vmatmul.f32.vlgmr.msra.gmra.mxu1 %v753_v13 }
 0x2c9   :  { %v777_v29 = vpop.f32.mrf.mxu1 }
 0x2ca   :  { %v778_v31 = vadd.f32 %v777_v29, %v758_v42 }
 0x2cc   :  { %780 = vst [vmem:[#allocation2] sm:$0xff] %v778_v31 }
 0x2cd   :  { %791 = dma.vmem_to_hbm [thread:$0]  %s787_s8, 128, %s789_s11, [#allocation3]  }
 0x2ce   :  { %894 = dma.done.wait [#allocation3], 128  }
 0x2cf   :  { %895 = vsyncadd [#allocation3], 4294967168 }
 0x2d0   :  { %796 = vsyncpa [#allocation3], 1 }

</bundles_post_ra>
